<compile_context>
chip_gen: v6e
topology: v6e:2x2x1
jax: 0.10.0
libtpu: 0.0.40
codegen_flags: <defaults>
</compile_context>

<pallas_src>
import math
import functools

import jax
import jax.numpy as jnp
from jax.experimental import pallas as pl
from jax.experimental.pallas import tpu as pltpu


# --------------------------- kernel body ------------------------------------

def _random_layer_kernel(*refs, n_inputs, denom):
    # refs = (x_0, w_0, x_1, w_1, ..., x_{n-1}, w_{n-1}, out)
    o_ref = refs[-1]
    acc = None
    for i in range(n_inputs):
        x = refs[2 * i][...]
        w = refs[2 * i + 1][...]
        y = jnp.dot(x, w, preferred_element_type=jnp.float32)
        if i == 0:
            acc = y / denom          # first term divided by output_dim ** (1/N)
        else:
            acc = acc * y            # elementwise (Hadamard) product
    o_ref[...] = acc.astype(o_ref.dtype)


# --------------------- hardware introspection (best effort) -----------------

def _tpu_generation_info():
    """Returns (vmem_capacity_bytes, is_v5e, two_tensorcores).

    Conservative fallback (64 MiB, single core) so generated tiles always fit
    v7x even when introspection is unavailable.
    """
    vmem_cap = 64 * 1024 * 1024
    is_v5 = False
    two_cores = False
    try:
        info = pltpu.get_tpu_info()
        cap = getattr(info, "vmem_capacity_bytes", None)
        name = ""
        for attr in ("chip_version", "version", "chip_name", "name"):
            val = getattr(info, attr, None)
            if val is not None:
                name = str(val).lower()
                break
        is_v5 = "5" in name
        if cap:
            vmem_cap = int(cap)
            # 64 MiB VMEM/TC is the v7x signature: 2 TensorCores per chip.
            two_cores = vmem_cap <= 64 * 1024 * 1024 and not is_v5
    except Exception:
        pass
    return vmem_cap, is_v5, two_cores


# ------------------------------ wrapper --------------------------------------

def random_layer(input_list, weight_list, *, tile_m=None, tile_n=None,
                 operand_dtype="auto", out_dtype=jnp.float32,
                 vmem_budget_bytes=None, inner_buffer_count=None):
    """Fused Pallas implementation of RandomLayer.forward.

    input_list[i]:  [M, K_i]
    weight_list[i]: [K_i, output_dim]
    returns:        [M, output_dim] in out_dtype (default float32)

    operand_dtype: "auto" -> bf16 operands (f32 accumulation) on v5e, f32
                   elsewhere; or pass an explicit dtype / None (= leave as is).
    out_dtype:     bf16 output halves writeback HBM bytes (looser numerics).
    inner_buffer_count: optional pipeline depth (e.g. 3) for the inner-varying
                   (re-fetched) operand when per-step DMA is exposed.
    """
    n = len(input_list)
    assert n == len(weight_list) and n >= 1
    M = input_list[0].shape[0]
    out_dim = weight_list[0].shape[1]
    k_list = [x.shape[1] for x in input_list]
    for x, w, k in zip(input_list, weight_list, k_list):
        assert x.shape == (M, k) and w.shape == (k, out_dim)

    vmem_cap, is_v5e, two_cores = _tpu_generation_info()

    if isinstance(operand_dtype, str) and operand_dtype == "auto":
        operand_dtype = jnp.bfloat16 if is_v5e else None
    if operand_dtype is not None:
        input_list = [x.astype(operand_dtype) for x in input_list]
        weight_list = [w.astype(operand_dtype) for w in weight_list]

    op_bytes = jnp.dtype(input_list[0].dtype).itemsize
    out_bytes = jnp.dtype(out_dtype).itemsize
    denom = math.pow(float(out_dim), 1.0 / n)

    # ---- generation-aware VMEM budget --------------------------------------
    if vmem_budget_bytes is None:
        frac = 0.58 if vmem_cap <= 64 * 1024 * 1024 else 0.70
        vmem_budget_bytes = int(vmem_cap * frac)
    limit_cap = int(vmem_cap * 0.75)

    # ---- tile granularities --------------------------------------------------
    # Sublane packing: 8 rows/vreg for f32, 16 for bf16, 32 for int8/fp8.
    m_gran = 8 if op_bytes >= 4 else (16 if op_bytes == 2 else 32)
    # MXU width: 128 on v5e, 256 on v6e/v7x.
    n_gran = 128 if is_v5e else 256

    def _round_tile_m(tm):
        tm = min(tm, M)
        if tm >= M:
            return M
        return max(m_gran, (tm // m_gran) * m_gran)

    def _round_tile_n(tn):
        tn = min(tn, out_dim)
        if tn >= out_dim:
            return out_dim
        return max(128, (tn // 128) * 128)

    def _vmem_bytes(tm, tn):
        # double-buffered input/output blocks + f32 matmul intermediates + slack
        ins = sum(tm * k + k * tn for k in k_list) * op_bytes
        outs = tm * tn * out_bytes
        interm = n * tm * tn * 4
        return 2 * (ins + outs) + interm + (1 << 20)

    # Candidate tiles: tile_m as large as possible (full batch first), tile_n
    # shrinks first in MXU-width steps, tile_m halving as the fallback.
    def _m_candidates():
        cands = []
        t = M
        while True:
            tm = _round_tile_m(t)
            if not cands or tm < cands[-1]:
                cands.append(tm)
            if tm <= m_gran:
                break
            t = tm // 2
        return cands

    def _n_candidates():
        cands = [out_dim]
        t = (out_dim // n_gran) * n_gran
        if t == out_dim:
            t -= n_gran
        while t >= n_gran:
            cands.append(t)
            t -= n_gran
        if n_gran > 128 and out_dim > 128 and 128 not in cands:
            cands.append(128)
        return cands

    m_cands = [_round_tile_m(tile_m)] if tile_m is not None else _m_candidates()
    n_cands = [_round_tile_n(tile_n)] if tile_n is not None else _n_candidates()

    chosen = None
    for tm in m_cands:
        for tn in n_cands:
            if _vmem_bytes(tm, tn) <= vmem_budget_bytes:
                chosen = (tm, tn)
                break
        if chosen is not None:
            break
    if chosen is None:                      # best effort: smallest combination
        chosen = (m_cands[-1], n_cands[-1])
    auto_tiles = tile_m is None and tile_n is None
    tile_m, tile_n = chosen

    # ---- v7x megacore: make sure the grid is shardable across 2 TCs ---------
    if two_cores and auto_tiles:
        if pl.cdiv(M, tile_m) * pl.cdiv(out_dim, tile_n) < 2:
            if out_dim >= 256:
                half = max(128, ((tile_n // 2) // 128) * 128)
                if half < tile_n:
                    tile_n = half
            elif M >= 2 * m_gran:
                half = max(m_gran, ((tile_m // 2) // m_gran) * m_gran)
                if half < tile_m:
                    tile_m = half

    vmem_est = _vmem_bytes(tile_m, tile_n)
    vmem_limit = int(min(max(32 * 1024 * 1024, vmem_est * 1.5), limit_cap))
    vmem_limit = max(vmem_limit, int(vmem_est))
    vmem_limit = min(vmem_limit, int(vmem_cap * 0.9))

    # ---- grid order: fetch the larger operand set exactly once --------------
    weight_bytes = sum(k * out_dim for k in k_list) * op_bytes
    act_bytes = M * sum(k_list) * op_bytes
    weights_outer = weight_bytes >= act_bytes

    grid_m = pl.cdiv(M, tile_m)
    grid_n = pl.cdiv(out_dim, tile_n)

    if weights_outer:
        # out-tiles outer, batch-tiles inner: each weight tile DMA'd once;
        # activations are the (smaller) re-fetched side.
        grid = (grid_n, grid_m)
        x_map = lambda j, i: (i, 0)
        w_map = lambda j, i: (0, j)
        o_map = lambda j, i: (i, j)
        inner_is_x = True
        refetch = grid_n
    else:
        # batch-tiles outer, out-tiles inner: activations DMA'd once; the
        # (smaller) weights are re-fetched.
        grid = (grid_m, grid_n)
        x_map = lambda i, j: (i, 0)
        w_map = lambda i, j: (0, j)
        o_map = lambda i, j: (i, j)
        inner_is_x = False
        refetch = grid_m

    x_kwargs, w_kwargs = {}, {}
    if inner_buffer_count is not None:
        if inner_is_x:
            x_kwargs = dict(pipeline_mode=pl.Buffered(inner_buffer_count))
        else:
            w_kwargs = dict(pipeline_mode=pl.Buffered(inner_buffer_count))

    in_specs = []
    operands = []
    for x, w, k in zip(input_list, weight_list, k_list):
        in_specs.append(pl.BlockSpec((tile_m, k), x_map, **x_kwargs))
        in_specs.append(pl.BlockSpec((k, tile_n), w_map, **w_kwargs))
        operands.extend([x, w])

    out_spec = pl.BlockSpec((tile_m, tile_n), o_map)

    kernel = functools.partial(_random_layer_kernel, n_inputs=n, denom=denom)

    flops = sum(2 * M * k * out_dim for k in k_list) + n * M * out_dim
    if weights_outer:
        bytes_accessed = (act_bytes * refetch + weight_bytes
                          + M * out_dim * out_bytes)
    else:
        bytes_accessed = (act_bytes + weight_bytes * refetch
                          + M * out_dim * out_bytes)

    return pl.pallas_call(
        kernel,
        out_shape=jax.ShapeDtypeStruct((M, out_dim), out_dtype),
        grid_spec=pltpu.PrefetchScalarGridSpec(
            num_scalar_prefetch=0,
            grid=grid,
            in_specs=in_specs,
            out_specs=out_spec,
        ),
        compiler_params=pltpu.CompilerParams(
            dimension_semantics=("parallel", "parallel"),
            vmem_limit_bytes=vmem_limit,
        ),
        cost_estimate=pl.CostEstimate(
            flops=int(flops), transcendentals=0,
            bytes_accessed=int(bytes_accessed)),
    )(*operands)


# ------------------------------ reference ------------------------------------

def random_layer_ref(input_list, weight_list):
    """Pure-JAX reference matching the PyTorch forward exactly."""
    n = len(input_list)
    out_dim = weight_list[0].shape[1]
    ys = [x.astype(jnp.float32) @ w.astype(jnp.float32)
          for x, w in zip(input_list, weight_list)]
    out = ys[0] / math.pow(float(out_dim), 1.0 / n)
    for y in ys[1:]:
        out = out * y
    return out


def _make_case(key, batch, input_dim_list, output_dim):
    keys = jax.random.split(key, 2 * len(input_dim_list))
    weight_list = [
        jax.random.normal(keys[i], (input_dim_list[i], output_dim), dtype=jnp.float32)
        for i in range(len(input_dim_list))
    ]
    input_list = [
        jax.random.normal(keys[len(input_dim_list) + i], (batch, input_dim_list[i]),
                          dtype=jnp.float32)
        for i in range(len(input_dim_list))
    ]
    return input_list, weight_list


if __name__ == "__main__":
    key = jax.random.PRNGKey(0)
    k1, k2, k3 = jax.random.split(key, 3)

    # Case 1: typical CDAN usage (features, class-probabilities).  Weight bytes
    # dominate -> weights-outer grid order, single lane-dense tile (split for
    # megacore on v7x).  f32 operands for tight parity.
    inputs, weights = _make_case(k1, batch=8, input_dim_list=[32, 16], output_dim=256)
    out = jax.block_until_ready(random_layer(inputs, weights, operand_dtype=jnp.float32))
    ref = random_layer_ref(inputs, weights)
    assert out.shape == (8, 256)
    assert jnp.allclose(out, ref, atol=1e-4, rtol=1e-4)

    # Case 2: user-specified tiles forcing partial blocks on both axes
    # (exercises the weights-outer tiled path).
    inputs2, weights2 = _make_case(k2, batch=20, input_dim_list=[48, 24], output_dim=640)
    out2 = jax.block_until_ready(
        random_layer(inputs2, weights2, tile_m=8, tile_n=256,
                     operand_dtype=jnp.float32))
    ref2 = random_layer_ref(inputs2, weights2)
    assert out2.shape == (20, 640)
    assert jnp.allclose(out2, ref2, atol=1e-4, rtol=1e-4)

    # Case 3: large batch, small out_dim -> activation bytes dominate, so the
    # grid order flips to batch-outer (activations fetched exactly once).
    inputs3, weights3 = _make_case(k3, batch=512, input_dim_list=[32, 16], output_dim=128)
    out3 = jax.block_until_ready(random_layer(inputs3, weights3, operand_dtype=jnp.float32))
    ref3 = random_layer_ref(inputs3, weights3)
    assert out3.shape == (512, 128)
    assert jnp.allclose(out3, ref3, atol=1e-4, rtol=1e-4)

    # Case 4: bf16 operand storage (halves weight/activation HBM bytes, f32
    # accumulation); looser tolerance since operands are quantized.
    out4 = jax.block_until_ready(
        random_layer(inputs, weights, operand_dtype=jnp.bfloat16))
    assert jnp.allclose(out4, ref, atol=5e-2, rtol=5e-2)

    # Case 5: default path ("auto" operand dtype -> bf16 only on v5e); loose
    # tolerance so it passes on every generation.
    out5 = jax.block_until_ready(random_layer(inputs, weights))
    assert jnp.allclose(out5, ref, atol=5e-2, rtol=5e-2)

    print("KERNEL_OK")
</pallas_src>

<mosaic_0001>
module attributes {stable_mosaic.version = 11 : i64} {
  func.func @_random_layer_kernel(%arg0: i32, %arg1: i32, %arg2: memref<8x32xf32, #tpu.memory_space<vmem>>, %arg3: memref<32x256xf32, #tpu.memory_space<vmem>>, %arg4: memref<8x16xf32, #tpu.memory_space<vmem>>, %arg5: memref<16x256xf32, #tpu.memory_space<vmem>>, %arg6: memref<8x256xf32, #tpu.memory_space<vmem>>) attributes {dimension_semantics = [#tpu.dimension_semantics<parallel>, #tpu.dimension_semantics<parallel>], iteration_bounds = array<i64: 1, 1>, scalar_prefetch = 0 : i64, scratch_operands = 0 : i64, tpu.core_type = #tpu.core_type<tc>, window_params = [{transform_indices = @transform_0, window_bounds = array<i64: 8, 32>}, {transform_indices = @transform_1, window_bounds = array<i64: 32, 256>}, {transform_indices = @transform_2, window_bounds = array<i64: 8, 16>}, {transform_indices = @transform_3, window_bounds = array<i64: 16, 256>}, {transform_indices = @transform_4, window_bounds = array<i64: 8, 256>}]} {
    %c0 = arith.constant 0 : index
    %c0_0 = arith.constant 0 : index
    %0 = vector.load %arg2[%c0, %c0_0] : memref<8x32xf32, #tpu.memory_space<vmem>>, vector<8x32xf32>
    %c0_1 = arith.constant 0 : index
    %c0_2 = arith.constant 0 : index
    %1 = vector.load %arg3[%c0_1, %c0_2] : memref<32x256xf32, #tpu.memory_space<vmem>>, vector<32x256xf32>
    %cst = arith.constant dense<0.000000e+00> : vector<8x256xf32>
    %2 = tpu.matmul %0, %1, %cst {dimension_numbers = #tpu.dot_dimension_numbers<[1], [0], [0], [1], [0, 0, 1, 1], [], []>} : vector<8x32xf32>, vector<32x256xf32>, vector<8x256xf32> -> vector<8x256xf32>
    %cst_3 = arith.constant 1.600000e+01 : f32
    %3 = vector.broadcast %cst_3 : f32 to vector<8x256xf32>
    %4 = arith.divf %2, %3 : vector<8x256xf32>
    %c0_4 = arith.constant 0 : index
    %c0_5 = arith.constant 0 : index
    %5 = vector.load %arg4[%c0_4, %c0_5] : memref<8x16xf32, #tpu.memory_space<vmem>>, vector<8x16xf32>
    %c0_6 = arith.constant 0 : index
    %c0_7 = arith.constant 0 : index
    %6 = vector.load %arg5[%c0_6, %c0_7] : memref<16x256xf32, #tpu.memory_space<vmem>>, vector<16x256xf32>
    %cst_8 = arith.constant dense<0.000000e+00> : vector<8x256xf32>
    %7 = tpu.matmul %5, %6, %cst_8 {dimension_numbers = #tpu.dot_dimension_numbers<[1], [0], [0], [1], [0, 0, 1, 1], [], []>} : vector<8x16xf32>, vector<16x256xf32>, vector<8x256xf32> -> vector<8x256xf32>
    %8 = arith.mulf %4, %7 : vector<8x256xf32>
    %c0_9 = arith.constant 0 : index
    %c0_10 = arith.constant 0 : index
    %9 = vector.load %arg6[%c0_9, %c0_10] : memref<8x256xf32, #tpu.memory_space<vmem>>, vector<8x256xf32>
    tpu.vector_store %arg6[%c0_9, %c0_10], %8 {strides = array<i32>} : memref<8x256xf32, #tpu.memory_space<vmem>>, vector<8x256xf32>,
    return
  }
  func.func @transform_0(%arg0: i32, %arg1: i32) -> (i32, i32) {
    %c0_i32 = arith.constant 0 : i32
    %c0_i32_0 = arith.constant 0 : i32
    return %arg1, %c0_i32 : i32, i32
  }
  func.func @transform_1(%arg0: i32, %arg1: i32) -> (i32, i32) {
    %c0_i32 = arith.constant 0 : i32
    %c0_i32_0 = arith.constant 0 : i32
    return %c0_i32, %arg0 : i32, i32
  }
  func.func @transform_2(%arg0: i32, %arg1: i32) -> (i32, i32) {
    %c0_i32 = arith.constant 0 : i32
    %c0_i32_0 = arith.constant 0 : i32
    return %arg1, %c0_i32 : i32, i32
  }
  func.func @transform_3(%arg0: i32, %arg1: i32) -> (i32, i32) {
    %c0_i32 = arith.constant 0 : i32
    %c0_i32_0 = arith.constant 0 : i32
    return %c0_i32, %arg0 : i32, i32
  }
  func.func @transform_4(%arg0: i32, %arg1: i32) -> (i32, i32) {
    %c0_i32 = arith.constant 0 : i32
    return %arg1, %arg0 : i32, i32
  }
}

</mosaic_0001>

<bundles_post_ra>
// kernel: tpu_custom_call.1
= control target key start
LH: loop header
LB: loop body
LE: loop exit
PB: predicated region body
PF: predicated region fallthrough
CT: control target
= control target key end

     0   :  { %9 = vsyncpa [#allocation3], 0  ;;  %s429_s0 = inlined_call_operand.hbm [shape: f32[8,32], index: 0, kind: input, shape index: {}]   ;;  %s430_s1 = inlined_call_operand.hbm [shape: f32[32,256], index: 1, kind: input, shape index: {}]   ;;  %s431_s2 = inlined_call_operand.hbm [shape: f32[8,16], index: 2, kind: input, shape index: {}]   ;;  %s432_s3 = inlined_call_operand.hbm [shape: f32[16,256], index: 3, kind: input, shape index: {}]   ;;  %s433_s4 = inlined_call_operand.hbm [shape: f32[8,256], index: 4, kind: output, shape index: {}]  }
   0x1   :  { %10 = vsyncpa [#allocation6], 0 }
   0x2   :  { %11 = vsyncpa [#allocation9], 0 }
   0x3   :  { %12 = vsyncpa [#allocation4], 0  ;;  %s375_s15 = smov [#allocation5]  }
   0x4   :  { %s28_s16 = sshll.u32 %s375_s15, 4  ;;  %s29_s16 = int_to_ptr.vmem [resolvable:$true] %s28_s16 }
   0x5   :  { %s275_s17 = scalar_lea.vmem %s29_s16, 1024  ;;  %p280_p1 = scmp.lt.s32.totalorder %s29_s16, %s29_s16 }
   0x6   :  { %p276_p0 = scmp.ne.s32.totalorder %s29_s16, %s275_s17  ;;  %p281_p2 = scmp.lt.s32.totalorder %s275_s17, %s275_s17 }
   0x8   :  { %p282_p3 = por %p281_p2, %p280_p1 }
   0xa   :  { %p283_p4 = pnand %p282_p3, %p276_p0 }
   0xc   :  { %286 = shalt.err (!%p283_p4)
}
   0xd   :  { %s376_s18 = smov 256   ;;  %s377_s19 = smov 16  }
   0xe   :  { %34 = dma.hbm_to_vmem [thread:$0]  %s430_s1, 1024, %s29_s16, [#allocation6], %s376_s18, %s376_s18, %s377_s19  }
   0xf   :  { %s378_s22 = smov [#allocation2]   ;;  %s379_s24 = smov [#allocation7]  }
  0x10   :  { %s19_s23 = sshll.u32 %s378_s22, 4  ;;  %s41_s25 = sshll.u32 %s379_s24, 4  ;;  %s20_s23 = int_to_ptr.vmem [resolvable:$true] %s19_s23  ;;  %s42_s25 = int_to_ptr.vmem [resolvable:$true] %s41_s25 }
  0x11   :  { %s295_s26 = scalar_lea.vmem %s20_s23, 128  ;;  %p300_p6 = scmp.lt.s32.totalorder %s20_s23, %s20_s23 }
  0x12   :  { %p296_p5 = scmp.ne.s32.totalorder %s20_s23, %s295_s26  ;;  %p301_p7 = scmp.lt.s32.totalorder %s295_s26, %s295_s26 }
  0x14   :  { %p302_p8 = por %p301_p7, %p300_p6 }
  0x16   :  { %p303_p9 = pnand %p302_p8, %p296_p5 }
  0x18   :  { %306 = shalt.err (!%p303_p9)
}
  0x19   :  { %22 = dma.hbm_to_vmem [thread:$0]  %s429_s0, 128, %s20_s23, [#allocation3]  }
  0x1a   :  { %s315_s29 = scalar_lea.vmem %s42_s25, 128  ;;  %p320_p11 = scmp.lt.s32.totalorder %s42_s25, %s42_s25 }
  0x1b   :  { %p316_p10 = scmp.ne.s32.totalorder %s42_s25, %s315_s29  ;;  %p321_p12 = scmp.lt.s32.totalorder %s315_s29, %s315_s29 }
  0x1d   :  { %p322_p13 = por %p321_p12, %p320_p11 }
  0x1f   :  { %p323_p0 = pnand %p322_p13, %p316_p10 }
  0x21   :  { %326 = shalt.err (!%p323_p0)
}
  0x22   :  { %44 = dma.hbm_to_vmem [thread:$0]  %s431_s2, 128, %s42_s25, [#allocation6]  }
  0x23   :  { %s380_s5 = smov [#allocation8]  }
  0x24   :  { %s50_s6 = sshll.u32 %s380_s5, 4  ;;  %s51_s6 = int_to_ptr.vmem [resolvable:$true] %s50_s6 }
  0x25   :  { %s335_s7 = scalar_lea.vmem %s51_s6, 512  ;;  %p340_p2 = scmp.lt.s32.totalorder %s51_s6, %s51_s6 }
  0x26   :  { %p336_p1 = scmp.ne.s32.totalorder %s51_s6, %s335_s7  ;;  %p341_p3 = scmp.lt.s32.totalorder %s335_s7, %s335_s7 }
  0x28   :  { %p342_p4 = por %p341_p3, %p340_p2 }
  0x2a   :  { %p343_p5 = pnand %p342_p4, %p336_p1 }
  0x2c   :  { %346 = shalt.err (!%p343_p5)
}
  0x2d   :  { %56 = dma.hbm_to_vmem [thread:$0]  %s432_s3, 512, %s51_s6, [#allocation9], %s376_s18, %s376_s18, %s377_s19  }
  0x2e   :  { %367 = dma.done.wait [#allocation3], 128  }
  0x2f   :  { %368 = vsyncadd [#allocation3], 4294967168 }
  0x30   :  { %369 = dma.done.wait [#allocation6], 1152  }
  0x31   :  { %370 = vsyncadd [#allocation6], 4294966144 }
  0x32   :  { %371 = dma.done.wait [#allocation9], 512  }
  0x33   :  { %372 = vsyncadd [#allocation9], 4294966784  ;;  %v381_v0 = vmov 0.0   ;;  %v77_v1 = vld [vmem:[#allocation5 + $0x38] sm:$0xff]  ;;  %v76_v2 = vld [vmem:[#allocation5 + $0x30] sm:$0xff]  ;;  %vm161_vm0 = vcmask 130048  }
  0x34   :  { %146 = vmatprep.mubr.f32.mxu0 %v381_v0  ;;  %229 = vmatprep.mubr.f32.mxu1 %v381_v0  ;;  %v75_v3 = vld [vmem:[#allocation5 + $0x28] sm:$0xff]  ;;  %v74_v4 = vld [vmem:[#allocation5 + $0x20] sm:$0xff]  ;;  %v73_v6 = vld [vmem:[#allocation5 + $0x18] sm:$0xff]  ;;  %vm78_vm1 = vcmask 261120   ;;  %s382_s2 = smov [#allocation10]  }
  0x35   :  { %106 = vmatprep.subr.mxu0 %v77_v1  ;;  %v160_v5 = vld [vmem:[#allocation8 + $0x18] sm:$0xff]  ;;  %v159_v7 = vld [vmem:[#allocation8 + $0x10] sm:$0xff]  ;;  %v72_v8 = vld [vmem:[#allocation5 + $0x10] sm:$0xff]  ;;  %s246_s3 = sshll.u32 %s382_s2, 4  ;;  %s247_s3 = int_to_ptr.vmem [resolvable:$true] %s246_s3 }
  0x36   :  { %107 = vmatpush1.msra.mxu0 %v76_v2  ;;  %193 = vmatprep.subr.mxu1 %v160_v5  ;;  %v158_v9 = vld [vmem:[#allocation8 + $0x8] sm:$0xff]  ;;  %v157_v10 = vld [vmem:[#allocation8] sm:$0xff]  ;;  %v156_v12 = vld [vmem:[#allocation7] sm:$0xff]  ;;  %s347_s9 = scalar_lea.vmem %s247_s3, 256  ;;  %p352_p7 = scmp.lt.s32.totalorder %s247_s3, %s247_s3 }
  0x37   :  { %108 = vmatprep.subr.mxu0 %v75_v3  ;;  %194 = vmatpush1.msra.mxu1 %v159_v7  ;;  %v71_v11 = vld [vmem:[#allocation5 + $0x8] sm:$0xff]  ;;  %v70_v13 = vld [vmem:[#allocation5] sm:$0xff]  ;;  %v69_v14 = vld [vmem:[#allocation2] sm:$0xff]  ;;  %p348_p6 = scmp.ne.s32.totalorder %s247_s3, %s347_s9  ;;  %p353_p8 = scmp.lt.s32.totalorder %s347_s9, %s347_s9 }
  0x38   :  { %109 = vmatpush1.msra.mxu0 %v74_v4  ;;  %195 = vmatprep.subr.mxu1 %v158_v9 }
  0x39   :  { %110 = vmatprep.subr.mxu0 %v73_v6  ;;  %196 = vmatpush1.msra.mxu1 %v157_v10  ;;  %p354_p9 = por %p353_p8, %p352_p7 }
  0x3a   :  { %111 = vmatpush1.msra.mxu0 %v72_v8  ;;  %258 = vmatmul.mubr.msk.f32.vlgmr.msra.gmra.mxu1 %vm161_vm0, %v156_v12 }
  0x3b   :  { %112 = vmatprep.subr.mxu0 %v71_v11  ;;  %p355_p10 = pnand %p354_p9, %p348_p6 }
  0x3c   :  { %113 = vmatpush1.msra.mxu0 %v70_v13 }
  0x3d   :  { %257 = vmatmul.mubr.msk.f32.vlgmr.msra.gmra.mxu0 %vm78_vm1, %v69_v14 }
  0xfa   :  { %v231_v16 = vpop.f32.mrf.mxu1 }
  0xfc   :  { %v233_v21 = vpop.f32.mrf.mxu1 }
  0xfd   :  { %v148_v15 = vpop.f32.mrf.mxu0 }
  0xfe   :  { %v154_v17 = vmul.f32 0.0625, %v148_v15 }
  0xff   :  { %v150_v18 = vpop.f32.mrf.mxu0 }
 0x100   :  { %v236_v19 = vmul.f32 %v231_v16, %v154_v17  ;;  %v155_v20 = vmul.f32 0.0625, %v150_v18 }
 0x102   :  { %238 = vst [vmem:[#allocation10] sm:$0xff] %v236_v19  ;;  %v237_v22 = vmul.f32 %v233_v21, %v155_v20 }
 0x104   :  { %239 = vst [vmem:[#allocation10 + $0x8] sm:$0xff] %v237_v22 }
 0x105   :  { %358 = shalt.err (!%p355_p10)
}
 0x106   :  { %249 = dma.vmem_to_hbm [thread:$0]  %s247_s3, 256, %s433_s4, [#allocation4]  }
 0x107   :  { %373 = dma.done.wait [#allocation4], 256  }
 0x108   :  { %374 = vsyncadd [#allocation4], 4294967040 }
 0x109   :  { %253 = vsyncpa [#allocation3], 1 }
 0x10a   :  { %254 = vsyncpa [#allocation6], 1 }
 0x10b   :  { %255 = vsyncpa [#allocation9], 1 }
 0x10c   :  { %256 = vsyncpa [#allocation4], 1 }

</bundles_post_ra>
